<compile_context>
chip_gen: v7x
topology: tpu7x:2x2x1
jax: 0.10.0
libtpu: 0.0.40
codegen_flags: <defaults>
</compile_context>

<pallas_src>
import functools

import jax
import jax.numpy as jnp
from jax.experimental import pallas as pl
from jax.experimental.pallas import tpu as pltpu


def _grad_kernel(x_ref, o_ref, prev_ref, acc_ref, *, td, penalty):
    """One grid step: accumulate |d/dD|, |d/dH|, |d/dW| sums for one D-slab.

    x_ref   : (1, TD, H, W) input slab (VMEM), original dtype
    o_ref   : (1, 3, W) f32 per-slice partials, written only at the last D step
              row 0 -> D-diff (dy), 1 -> H-diff (dx), 2 -> W-diff (dz)
    prev_ref: (H, W) VMEM scratch carrying the previous slab's last plane
    acc_ref : (3, H, W) f32 persistent accumulator scratch
    """
    di = pl.program_id(1)
    nd = pl.num_programs(1)

    @pl.when(di == 0)
    def _init():
        acc_ref[...] = jnp.zeros_like(acc_ref)

    x = x_ref[0]                      # (TD, H, W), input dtype
    h, w = x.shape[1], x.shape[2]

    def pen(diff):
        v = jnp.abs(diff).astype(jnp.float32)
        if penalty == "l2":
            v = v * v
        return v

    # ---- D-diff (dy): pairs fully inside this slab ----
    if td > 1:
        acc_ref[0] += jnp.sum(pen(x[1:] - x[:-1]), axis=0)

    # ---- D-diff across the slab boundary (previous slab's last plane) ----
    @pl.when(di > 0)
    def _boundary():
        acc_ref[0] += pen(x[0] - prev_ref[...])

    # Carry this slab's last plane to the next grid step.
    prev_ref[...] = x[td - 1]

    # ---- H-diff (dx): sublane-axis difference ----
    if h > 1:
        acc_ref[1, : h - 1, :] += jnp.sum(pen(x[:, 1:, :] - x[:, :-1, :]), axis=0)

    # ---- W-diff (dz): lane-axis difference ----
    if w > 1:
        acc_ref[2, :, : w - 1] += jnp.sum(pen(x[:, :, 1:] - x[:, :, :-1]), axis=0)

    # ---- finalize: collapse the sublane (H) axis, emit tiny (3, W) partials ----
    @pl.when(di == nd - 1)
    def _finalize():
        o_ref[0] = jnp.sum(acc_ref[...], axis=1)


def _pick_d_tile(d, plane_bytes, target_bytes):
    """Largest divisor of d whose (TD, H, W) slab fits in target_bytes (>=1)."""
    best = 1
    for cand in range(1, d + 1):
        if d % cand == 0 and cand * plane_bytes <= target_bytes:
            best = cand
    return best


def grad_loss(y_pred, penalty="l1", *, tile_target_bytes=2 * 1024 * 1024):
    """JAX/Pallas equivalent of Grad(penalty).forward(y_pred); y_pred is NCDHW."""
    n, c, d, h, w = y_pred.shape
    nc = n * c
    x = y_pred.reshape(nc, d, h, w)

    plane_bytes = h * w * y_pred.dtype.itemsize
    td = _pick_d_tile(d, plane_bytes, tile_target_bytes)
    nd = d // td

    partials = pl.pallas_call(
        functools.partial(_grad_kernel, td=td, penalty=penalty),
        out_shape=jax.ShapeDtypeStruct((nc, 3, w), jnp.float32),
        grid_spec=pltpu.PrefetchScalarGridSpec(
            num_scalar_prefetch=0,
            grid=(nc, nd),
            in_specs=[pl.BlockSpec((1, td, h, w), lambda b, i: (b, i, 0, 0))],
            out_specs=pl.BlockSpec((1, 3, w), lambda b, i: (b, 0, 0)),
            scratch_shapes=[
                pltpu.VMEM((h, w), y_pred.dtype),       # previous D plane
                pltpu.VMEM((3, h, w), jnp.float32),     # running sums
            ],
        ),
        compiler_params=pltpu.CompilerParams(
            dimension_semantics=("parallel", "arbitrary"),
            vmem_limit_bytes=40 * 1024 * 1024,
        ),
    )(x)

    # Tiny final reduction of per-slice (3, W) partial sums outside the kernel.
    sums = jnp.sum(partials, axis=(0, 2))      # [sum_dy, sum_dx, sum_dz]

    cnt_dy = nc * (d - 1) * h * w
    cnt_dx = nc * d * (h - 1) * w
    cnt_dz = nc * d * h * (w - 1)

    mean_dy = sums[0] / jnp.float32(cnt_dy)
    mean_dx = sums[1] / jnp.float32(cnt_dx)
    mean_dz = sums[2] / jnp.float32(cnt_dz)
    return (mean_dx + mean_dy + mean_dz) / jnp.float32(3.0)


def _grad_loss_ref(y_pred, penalty="l1"):
    """Pure-JAX reference (mirrors the PyTorch module)."""
    dy = jnp.abs(y_pred[:, :, 1:, :, :] - y_pred[:, :, :-1, :, :])
    dx = jnp.abs(y_pred[:, :, :, 1:, :] - y_pred[:, :, :, :-1, :])
    dz = jnp.abs(y_pred[:, :, :, :, 1:] - y_pred[:, :, :, :, :-1])
    if penalty == "l2":
        dy, dx, dz = dy * dy, dx * dx, dz * dz
    return (jnp.mean(dx) + jnp.mean(dy) + jnp.mean(dz)) / 3.0


if __name__ == "__main__":
    key = jax.random.PRNGKey(0)
    shapes = [
        (2, 3, 6, 8, 16),    # small W (< 128): original test shape
        (2, 2, 8, 8, 128),   # lane-dense W
    ]
    for shape in shapes:
        hh, ww = shape[3], shape[4]
        y_pred = jax.random.normal(key, shape, dtype=jnp.float32)
        for penalty in ("l1", "l2"):
            ref = jax.block_until_ready(_grad_loss_ref(y_pred, penalty))
            # Default tiling, plus a tiny tile target that forces several
            # D-tiles (exercises the carried-boundary-plane + finalize paths).
            for tgt in (2 * 1024 * 1024, 2 * hh * ww * 4):
                out = grad_loss(y_pred, penalty, tile_target_bytes=tgt)
                out = jax.block_until_ready(out)
                assert jnp.allclose(out, ref, rtol=1e-4, atol=1e-6), (
                    shape, penalty, tgt, out, ref)
    print("KERNEL_OK")
</pallas_src>

<mosaic_0001>
module attributes {stable_mosaic.version = 11 : i64} {
  func.func @_grad_kernel(%arg0: i32, %arg1: i32, %arg2: memref<1x6x8x16xf32, #tpu.memory_space<vmem>>, %arg3: memref<1x3x16xf32, #tpu.memory_space<vmem>>, %arg4: memref<8x16xf32, #tpu.memory_space<vmem>>, %arg5: memref<3x8x16xf32, #tpu.memory_space<vmem>>) attributes {dimension_semantics = [#tpu.dimension_semantics<parallel>, #tpu.dimension_semantics<arbitrary>], iteration_bounds = array<i64: 6, 1>, scalar_prefetch = 0 : i64, scratch_operands = 2 : i64, tpu.core_type = #tpu.core_type<tc>, window_params = [{transform_indices = @transform_0, window_bounds = array<i64: 1, 6, 8, 16>}, {transform_indices = @transform_1, window_bounds = array<i64: 1, 3, 16>}]} {
    %c0_i32 = arith.constant 0 : i32
    %0 = arith.cmpi eq, %arg1, %c0_i32 : i32
    %1 = arith.extui %0 : i1 to i32
    %c0_i32_0 = arith.constant 0 : i32
    %2 = arith.cmpi ne, %1, %c0_i32_0 : i32
    scf.if %2 {
      %cst_28 = arith.constant 0.000000e+00 : f32
      %47 = vector.broadcast %cst_28 : f32 to vector<3x8x16xf32>
      %c0_29 = arith.constant 0 : index
      %c0_30 = arith.constant 0 : index
      %c0_31 = arith.constant 0 : index
      %48 = vector.load %arg5[%c0_29, %c0_30, %c0_31] : memref<3x8x16xf32, #tpu.memory_space<vmem>>, vector<3x8x16xf32>
      tpu.vector_store %arg5[%c0_29, %c0_30, %c0_31], %47 {strides = array<i32>} : memref<3x8x16xf32, #tpu.memory_space<vmem>>, vector<3x8x16xf32>,
    } else {
    }
    %c0 = arith.constant 0 : index
    %c0_1 = arith.constant 0 : index
    %c0_2 = arith.constant 0 : index
    %c0_3 = arith.constant 0 : index
    %3 = vector.load %arg2[%c0, %c0_1, %c0_2, %c0_3] : memref<1x6x8x16xf32, #tpu.memory_space<vmem>>, vector<1x6x8x16xf32>
    %4 = vector.shape_cast %3 : vector<1x6x8x16xf32> to vector<6x8x16xf32>
    %c0_4 = arith.constant 0 : index
    %c0_5 = arith.constant 0 : index
    %c0_6 = arith.constant 0 : index
    %5 = vector.load %arg5[%c0_4, %c0_5, %c0_6] : memref<3x8x16xf32, #tpu.memory_space<vmem>>, vector<1x8x16xf32>
    %6 = vector.shape_cast %5 : vector<1x8x16xf32> to vector<8x16xf32>
    %7 = vector.extract_strided_slice %4 {offsets = [1, 0, 0], sizes = [5, 8, 16], strides = [1, 1, 1]} : vector<6x8x16xf32> to vector<5x8x16xf32>
    %8 = vector.extract_strided_slice %4 {offsets = [0, 0, 0], sizes = [5, 8, 16], strides = [1, 1, 1]} : vector<6x8x16xf32> to vector<5x8x16xf32>
    %9 = arith.subf %7, %8 : vector<5x8x16xf32>
    %10 = math.absf %9 : vector<5x8x16xf32>
    %cst = arith.constant dense<0.000000e+00> : vector<8x16xf32>
    %11 = vector.multi_reduction <add>, %10, %cst [0] : vector<5x8x16xf32> to vector<8x16xf32>
    %12 = arith.addf %6, %11 : vector<8x16xf32>
    %c0_7 = arith.constant 0 : index
    %c0_8 = arith.constant 0 : index
    %c0_9 = arith.constant 0 : index
    %13 = vector.load %arg5[%c0_7, %c0_8, %c0_9] : memref<3x8x16xf32, #tpu.memory_space<vmem>>, vector<1x8x16xf32>
    %14 = vector.shape_cast %13 : vector<1x8x16xf32> to vector<8x16xf32>
    %15 = vector.shape_cast %12 : vector<8x16xf32> to vector<1x8x16xf32>
    tpu.vector_store %arg5[%c0_7, %c0_8, %c0_9], %15 {strides = array<i32>} : memref<3x8x16xf32, #tpu.memory_space<vmem>>, vector<1x8x16xf32>,
    %c0_i32_10 = arith.constant 0 : i32
    %16 = arith.cmpi sgt, %arg1, %c0_i32_10 : i32
    %17 = arith.extui %16 : i1 to i32
    %c0_i32_11 = arith.constant 0 : i32
    %18 = arith.cmpi ne, %17, %c0_i32_11 : i32
    scf.if %18 {
      %c0_28 = arith.constant 0 : index
      %c0_29 = arith.constant 0 : index
      %c0_30 = arith.constant 0 : index
      %47 = vector.load %arg5[%c0_28, %c0_29, %c0_30] : memref<3x8x16xf32, #tpu.memory_space<vmem>>, vector<1x8x16xf32>
      %48 = vector.shape_cast %47 : vector<1x8x16xf32> to vector<8x16xf32>
      %49 = vector.extract_strided_slice %4 {offsets = [0, 0, 0], sizes = [1, 8, 16], strides = [1, 1, 1]} : vector<6x8x16xf32> to vector<1x8x16xf32>
      %50 = vector.shape_cast %49 : vector<1x8x16xf32> to vector<8x16xf32>
      %c0_31 = arith.constant 0 : index
      %c0_32 = arith.constant 0 : index
      %51 = vector.load %arg4[%c0_31, %c0_32] : memref<8x16xf32, #tpu.memory_space<vmem>>, vector<8x16xf32>
      %52 = arith.subf %50, %51 : vector<8x16xf32>
      %53 = math.absf %52 : vector<8x16xf32>
      %54 = arith.addf %48, %53 : vector<8x16xf32>
      %c0_33 = arith.constant 0 : index
      %c0_34 = arith.constant 0 : index
      %c0_35 = arith.constant 0 : index
      %55 = vector.load %arg5[%c0_33, %c0_34, %c0_35] : memref<3x8x16xf32, #tpu.memory_space<vmem>>, vector<1x8x16xf32>
      %56 = vector.shape_cast %55 : vector<1x8x16xf32> to vector<8x16xf32>
      %57 = vector.shape_cast %54 : vector<8x16xf32> to vector<1x8x16xf32>
      tpu.vector_store %arg5[%c0_33, %c0_34, %c0_35], %57 {strides = array<i32>} : memref<3x8x16xf32, #tpu.memory_space<vmem>>, vector<1x8x16xf32>,
    } else {
    }
    %19 = vector.extract_strided_slice %4 {offsets = [5, 0, 0], sizes = [1, 8, 16], strides = [1, 1, 1]} : vector<6x8x16xf32> to vector<1x8x16xf32>
    %20 = vector.shape_cast %19 : vector<1x8x16xf32> to vector<8x16xf32>
    %c0_12 = arith.constant 0 : index
    %c0_13 = arith.constant 0 : index
    %21 = vector.load %arg4[%c0_12, %c0_13] : memref<8x16xf32, #tpu.memory_space<vmem>>, vector<8x16xf32>
    tpu.vector_store %arg4[%c0_12, %c0_13], %20 {strides = array<i32>} : memref<8x16xf32, #tpu.memory_space<vmem>>, vector<8x16xf32>,
    %c1 = arith.constant 1 : index
    %c0_14 = arith.constant 0 : index
    %c0_15 = arith.constant 0 : index
    %22 = vector.load %arg5[%c1, %c0_14, %c0_15] : memref<3x8x16xf32, #tpu.memory_space<vmem>>, vector<1x7x16xf32>
    %23 = vector.shape_cast %22 : vector<1x7x16xf32> to vector<7x16xf32>
    %24 = vector.extract_strided_slice %4 {offsets = [0, 1, 0], sizes = [6, 7, 16], strides = [1, 1, 1]} : vector<6x8x16xf32> to vector<6x7x16xf32>
    %25 = vector.extract_strided_slice %4 {offsets = [0, 0, 0], sizes = [6, 7, 16], strides = [1, 1, 1]} : vector<6x8x16xf32> to vector<6x7x16xf32>
    %26 = arith.subf %24, %25 : vector<6x7x16xf32>
    %27 = math.absf %26 : vector<6x7x16xf32>
    %cst_16 = arith.constant dense<0.000000e+00> : vector<7x16xf32>
    %28 = vector.multi_reduction <add>, %27, %cst_16 [0] : vector<6x7x16xf32> to vector<7x16xf32>
    %29 = arith.addf %23, %28 : vector<7x16xf32>
    %c1_17 = arith.constant 1 : index
    %c0_18 = arith.constant 0 : index
    %c0_19 = arith.constant 0 : index
    %30 = vector.load %arg5[%c1_17, %c0_18, %c0_19] : memref<3x8x16xf32, #tpu.memory_space<vmem>>, vector<1x7x16xf32>
    %31 = vector.shape_cast %30 : vector<1x7x16xf32> to vector<7x16xf32>
    %32 = vector.shape_cast %29 : vector<7x16xf32> to vector<1x7x16xf32>
    tpu.vector_store %arg5[%c1_17, %c0_18, %c0_19], %32 {strides = array<i32>} : memref<3x8x16xf32, #tpu.memory_space<vmem>>, vector<1x7x16xf32>,
    %c2 = arith.constant 2 : index
    %c0_20 = arith.constant 0 : index
    %c0_21 = arith.constant 0 : index
    %33 = vector.load %arg5[%c2, %c0_20, %c0_21] : memref<3x8x16xf32, #tpu.memory_space<vmem>>, vector<1x8x15xf32>
    %34 = vector.shape_cast %33 : vector<1x8x15xf32> to vector<8x15xf32>
    %35 = vector.extract_strided_slice %4 {offsets = [0, 0, 1], sizes = [6, 8, 15], strides = [1, 1, 1]} : vector<6x8x16xf32> to vector<6x8x15xf32>
    %36 = vector.extract_strided_slice %4 {offsets = [0, 0, 0], sizes = [6, 8, 15], strides = [1, 1, 1]} : vector<6x8x16xf32> to vector<6x8x15xf32>
    %37 = arith.subf %35, %36 : vector<6x8x15xf32>
    %38 = math.absf %37 : vector<6x8x15xf32>
    %cst_22 = arith.constant dense<0.000000e+00> : vector<8x15xf32>
    %39 = vector.multi_reduction <add>, %38, %cst_22 [0] : vector<6x8x15xf32> to vector<8x15xf32>
    %40 = arith.addf %34, %39 : vector<8x15xf32>
    %c2_23 = arith.constant 2 : index
    %c0_24 = arith.constant 0 : index
    %c0_25 = arith.constant 0 : index
    %41 = vector.load %arg5[%c2_23, %c0_24, %c0_25] : memref<3x8x16xf32, #tpu.memory_space<vmem>>, vector<1x8x15xf32>
    %42 = vector.shape_cast %41 : vector<1x8x15xf32> to vector<8x15xf32>
    %43 = vector.shape_cast %40 : vector<8x15xf32> to vector<1x8x15xf32>
    tpu.vector_store %arg5[%c2_23, %c0_24, %c0_25], %43 {strides = array<i32>} : memref<3x8x16xf32, #tpu.memory_space<vmem>>, vector<1x8x15xf32>,
    %c0_i32_26 = arith.constant 0 : i32
    %44 = arith.cmpi eq, %arg1, %c0_i32_26 : i32
    %45 = arith.extui %44 : i1 to i32
    %c0_i32_27 = arith.constant 0 : i32
    %46 = arith.cmpi ne, %45, %c0_i32_27 : i32
    scf.if %46 {
      %c0_28 = arith.constant 0 : index
      %c0_29 = arith.constant 0 : index
      %c0_30 = arith.constant 0 : index
      %47 = vector.load %arg5[%c0_28, %c0_29, %c0_30] : memref<3x8x16xf32, #tpu.memory_space<vmem>>, vector<3x8x16xf32>
      %cst_31 = arith.constant dense<0.000000e+00> : vector<3x16xf32>
      %48 = vector.multi_reduction <add>, %47, %cst_31 [1] : vector<3x8x16xf32> to vector<3x16xf32>
      %c0_32 = arith.constant 0 : index
      %c0_33 = arith.constant 0 : index
      %c0_34 = arith.constant 0 : index
      %49 = vector.load %arg3[%c0_32, %c0_33, %c0_34] : memref<1x3x16xf32, #tpu.memory_space<vmem>>, vector<1x3x16xf32>
      %50 = vector.shape_cast %49 : vector<1x3x16xf32> to vector<3x16xf32>
      %51 = vector.shape_cast %48 : vector<3x16xf32> to vector<1x3x16xf32>
      tpu.vector_store %arg3[%c0_32, %c0_33, %c0_34], %51 {strides = array<i32>} : memref<1x3x16xf32, #tpu.memory_space<vmem>>, vector<1x3x16xf32>,
    } else {
    }
    return
  }
  func.func @transform_0(%arg0: i32, %arg1: i32) -> (i32, i32, i32, i32) {
    %c0_i32 = arith.constant 0 : i32
    %c0_i32_0 = arith.constant 0 : i32
    %c0_i32_1 = arith.constant 0 : i32
    return %arg0, %arg1, %c0_i32, %c0_i32_0 : i32, i32, i32, i32
  }
  func.func @transform_1(%arg0: i32, %arg1: i32) -> (i32, i32, i32) {
    %c0_i32 = arith.constant 0 : i32
    %c0_i32_0 = arith.constant 0 : i32
    %c0_i32_1 = arith.constant 0 : i32
    return %arg0, %c0_i32, %c0_i32_0 : i32, i32, i32
  }
}

</mosaic_0001>

<bundles_post_ra>
// kernel: tpu_custom_call.1
= control target key start
LH: loop header
LB: loop body
LE: loop exit
PB: predicated region body
PF: predicated region fallthrough
CT: control target
= control target key end

     0   :  { %6 = vsyncpa [#allocation5], 0  ;;  %s887_s0 = inlined_call_operand.hbm [shape: f32[6,6,8,16], index: 0, kind: input, shape index: {}]   ;;  %s888_s1 = inlined_call_operand.hbm [shape: f32[6,3,16], index: 1, kind: output, shape index: {}]  }
   0x1   :  { %8 = vsyncpa [#allocation5 + $0x1], 0 }
   0x2   :  { %9 = vsyncpa [#allocation6], 0 }
   0x3   :  { %11 = vsyncpa [#allocation6 + $0x1], 0  ;;  %s645_s6 = smov 0   ;;  %s647_s7 = smov 0  }
   0x4   :  { %s649_s8 = smov 0   ;;  %s651_s9 = smov 0  }
   0x5   :  { %s653_s10 = smov 0   ;;  %s655_s11 = smov 0  }
   0x6 LB: > { %s433_s12 = sadd.s32 4294967295, %s626_s11   ;;  %s434_s13 = sadd.s32 4294967294, %s626_s11   ;;  %s626_s11 = sphi %s655_s11, %s17_s11   ;;  %s622_s10 = sphi %s653_s10, %s902_s10   ;;  %s618_s9 = sphi %s651_s9, %s901_s9   ;;  %s614_s8 = sphi %s649_s8, %s900_s8   ;;  %s610_s7 = sphi %s647_s7, %s899_s7   ;;  %s606_s6 = sphi %s645_s6, %s898_s6  }
   0x7   : > { %s29_s14 = sadd.s32 1, %s622_s10  ;;  %s38_s15 = sadd.s32 1, %s614_s8 }
   0x8   : > { %p31_p0 = scmp.ge.s32.totalorder %s29_s14, 6  ;;  %p45_p1 = scmp.ne.s32.totalorder %s614_s8, %s610_s7 }
   0x9   : > { %p46_p2 = scmp.eq.s32.totalorder %s626_s11, 0  ;;  %p51_p3 = scmp.ne.s32.totalorder %s610_s7, %s606_s6 }
   0xa   : > { %s904_s14 = smov (%p31_p0, %s29_s14), 0  ;;  %p52_p5 = scmp.eq.s32.totalorder %s433_s12, 0 }
   0xb   : > { %p686_p4 = por %p46_p2, %p45_p1  ;;  %s33_s17 = ssub.s32 %s622_s10, %s904_s14 }
   0xc   : > { %p75_p6 = scmp.eq.s32.totalorder %s433_s12, 5  ;;  %p36_p7 = scmp.eq.s32.totalorder %s33_s17, 0 }
   0xd   : > { %p692_p8 = por %p52_p5, %p51_p3  ;;  %p81_p10 = scmp.eq.s32.totalorder %s434_s13, 5 }
   0xe   : > { %p696_p9 = por %p75_p6, %p45_p1  ;;  %p459_p12 = scmp.lt.s32.totalorder %s626_s11, 6 }
   0xf   : > { %s701_s20 = scalar_select %p36_p7, %s614_s8, %s38_s15  }
  0x10   : > { %s892_s19 = scalar_select %p696_p9, 1, 0 }
  0x11   : > { %p703_p11 = por %p81_p10, %p51_p3  ;;  %s101_s22 = sand.u32 1, %s614_s8  }
  0x12   : > { %s444_s23 = smul.u32 48, %s101_s22  ;;  %p712_p13 = pnand %p459_p12, %p686_p4 }
  0x13   : > { %s893_s21 = scalar_select %p703_p11, 1, 0 }
  0x14   : > { %s445_s24 = smul.u32 768, %s622_s10  ;;  %s105_s29 = scalar_lea.vmem [#allocation4], %s444_s23 }
  0x15   : > { %s114_s30 = sshll.u32 %s105_s29, 4  ;;  %s724_s2 = scalar_lea.sflag [#allocation5], %s101_s22  ;;  %s721_s30 = int_to_ptr.vmem [resolvable:$true] %s114_s30 }
  0x16   : > { %s719_s28 = scalar_lea.hbm %s887_s0, %s445_s24  ;;  %p516_p2 = pneg %p712_p13 }
  0x17   : > { %s514_s3 = scalar_lea.hbm %s719_s28, 768  ;;  %s519_s12 = scalar_lea.hbm %s887_s0, 4608 }
  0x18   : > { %p515_p1 = scmp.ne.s32.totalorder %s719_s28, %s514_s3  ;;  %p520_p5 = scmp.lt.u32.totalorder %s719_s28, %s887_s0 }
  0x19   : > { %p521_p6 = scmp.lt.u32.totalorder %s519_s12, %s514_s3  ;;  %p523_p10 = scmp.lt.u32.totalorder %s514_s3, %s719_s28 }
  0x1a   : > { %p517_p3 = pnand %p516_p2, %p515_p1 }
  0x1b   : > { %p522_p7 = por %p521_p6, %p520_p5 }
  0x1c   : > { %p518_p4 = pneg %p517_p3 }
  0x1d   : > { %p524_p12 = por %p523_p10, %p522_p7 }
  0x1f   : > { %p525_p0 = pnand %p524_p12, %p518_p4 }
  0x21   : > { %528 = shalt.err (!%p525_p0)
}
  0x22   : > { %s529_s16 = scalar_lea.vmem %s721_s30, 768  ;;  %s628_s17 = smov [#allocation4]  }
  0x23   : > { %p530_p1 = scmp.ne.s32.totalorder %s721_s30, %s529_s16  ;;  %s534_s22 = sshll.u32 %s628_s17, 4  ;;  %s535_s22 = int_to_ptr.vmem [resolvable:$false] %s534_s22 }
  0x24   : > { %s536_s23 = scalar_lea.vmem %s535_s22, 1536  ;;  %p537_p9 = scmp.lt.s32.totalorder %s721_s30, %s535_s22 }
  0x25   : > { %p532_p3 = pnand %p530_p1, %p516_p2  ;;  %p538_p5 = scmp.lt.s32.totalorder %s536_s23, %s529_s16 }
  0x27   : > { %p533_p11 = pneg %p532_p3  ;;  %p539_p6 = por %p538_p5, %p537_p9 }
  0x29   : > { %p540_p7 = pnand %p539_p6, %p533_p11 }
  0x2b   : > { %543 = shalt.err (!%p540_p7)
}
  0x2c   : > { %s629_s24 = smov 128   ;;  %s630_s26 = smov 8  }
  0x2d   : > { %454 = dma.hbm_to_vmem [thread:$0]  (!%p712_p13), %s719_s28, 768, %s721_s30, %s724_s2, %s629_s24, %s629_s24, %s630_s26  }
  0x2e   : > { %p122_p0 = scmp.lt.s32.totalorder %s626_s11, 7  ;;  %p895_p2 = scmp.ge.s32.totalorder %s626_s11, 1 }
  0x30   : > { %p123_p4 = pnand %p895_p2, %p122_p0 }
  0x31   : > { %s756_s27 = sand.u32 (!%p123_p4), 1, %s610_s7  }
  0x32   : > { %126 = sbr.rel (%p123_p4) target bundleno = 346 (0x15a), region = 24  ;;  %s129_s3 = scalar_lea.sflag (!%p123_p4), [#allocation5], %s756_s27 }
  0x33   : > { %s446_s29 = smul.u32 (!%p123_p4), 48, %s756_s27 }
  0x35   : > { %s132_s4 = scalar_lea.vmem (!%p123_p4), [#allocation4], %s446_s29 }
  0x39   : > { %597 = dma.done.wait (%p692_p8), %s129_s3, 768  }
  0x3a   : > { %599 = vsyncadd (%p692_p8), %s129_s3, 4294966528  ;;  %v764_v0 = vld [vmem:[%s132_s4] sm:$0xff]  ;;  %v766_v1 = vld [vmem:[%s132_s4 + $0x10] sm:$0xff]  ;;  %s631_s25 = smov 1   ;;  %vm156_vm0 = vcmask 130048   ;;  %v632_v6 = vmov 0.0  }
  0x3b   : > { %252 = vrot.lane.b32.xlu0 %v764_v0, %s631_s25  ;;  %256 = vrot.lane.b32.xlu1 %v766_v1, %s631_s25  ;;  %v770_v2 = vld [vmem:[%s132_s4 + $0x8] sm:$0xff]  ;;  %v772_v3 = vld [vmem:[%s132_s4 + $0x18] sm:$0xff]  ;;  %157 = vst.msk [vmem:[#allocation3] sm:$0xff] %vm156_vm0, %v632_v6  ;;  %158 = vst.msk [vmem:[#allocation3 + $0x8] sm:$0xff] %vm156_vm0, %v632_v6  ;;  %v208_v7 = vrot.slane %v764_v0, 7  ;;  %v210_v10 = vrot.slane %v766_v1, 7 }
  0x3c   : > { %v774_v4 = vld [vmem:[%s132_s4 + $0x28] sm:$0xff]  ;;  %v778_v5 = vld [vmem:[%s132_s4 + $0x20] sm:$0xff]  ;;  %159 = vst.msk [vmem:[#allocation3 + $0x10] sm:$0xff] %vm156_vm0, %v632_v6  ;;  %v209_v8 = vrot.slane %v770_v2, 7  ;;  %v211_v12 = vrot.slane %v772_v3, 7  ;;  %vm232_vm1 = vcmask 130049   ;;  %v168_v16 = vsub.f32 %v766_v1, %v770_v2 }
  0x3d   : > { %v220_v9 = vsub.f32 %v764_v0, %v208_v7  ;;  %v222_v14 = vsub.f32 %v766_v1, %v210_v10  ;;  %v167_v17 = vsub.f32 %v770_v2, %v764_v0  ;;  %v212_v22 = vrot.slane %v778_v5, 7  ;;  %s633_s18 = smov 127   ;;  %s439_s28 = sshll.u32 %s756_s27, 2 }
  0x3e   : > { %v221_v11 = vsub.f32 %v770_v2, %v209_v8  ;;  %v223_v18 = vsub.f32 %v772_v3, %v211_v12  ;;  %v173_v23 = vand.u32 2147483647, %v168_v16  ;;  %v169_v26 = vsub.f32 %v772_v3, %v766_v1  ;;  %s441_s30 = sshll.u32 %s618_s9, 6  ;;  %s150_s2 = scalar_lea.vmem [#allocation7], %s439_s28 }
  0x3f   : > { %254 = vrot.lane.b32.xlu0 %v770_v2, %s631_s25  ;;  %258 = vrot.lane.b32.xlu1 %v772_v3, %s631_s25  ;;  %v226_v13 = vand.u32 2147483647, %v220_v9  ;;  %v228_v20 = vand.u32 2147483647, %v222_v14  ;;  %v172_v24 = vand.u32 2147483647, %v167_v17  ;;  %v224_v29 = vsub.f32 %v778_v5, %v212_v22  ;;  %s839_s15 = scalar_lea.hbm %s888_s1, %s441_s30 }
  0x40   : > { %v227_v15 = vand.u32 2147483647, %v221_v11  ;;  %v229_v28 = vand.u32 2147483647, %v223_v18  ;;  %v213_v30 = vrot.slane %v774_v4, 7  ;;  %v179_v31 = vsel %vm156_vm0, %v173_v23, 0.0 }
  0x41   : > { %v233_v19 = vsel %vm232_vm1, %v226_v13, 0.0  ;;  %v236_v27 = vsel %vm232_vm1, %v228_v20, 0.0  ;;  %v174_v33 = vand.u32 2147483647, %v169_v26  ;;  %v170_v34 = vsub.f32 %v778_v5, %v772_v3  ;;  %s352_s5 = sshll.u32 %s150_s2, 4  ;;  %s339_s16 = scalar_lea.sflag [#allocation6], %s756_s27  ;;  %s841_s5 = int_to_ptr.vmem [resolvable:$true] %s352_s5 }
  0x42   : > { %v234_v21 = vsel %vm232_vm1, %v227_v15, 0.0  ;;  %v178_v35 = vsel %vm156_vm0, %v172_v24, 0.0  ;;  %v238_v36 = vsel %vm232_vm1, %v229_v28, 0.0  ;;  %v230_v37 = vand.u32 2147483647, %v224_v29  ;;  %v166_v7 = vld [vmem:[#allocation3] sm:$0xff] }
  0x43   : > { %260 = vrot.lane.b32.xlu0 %v778_v5, %s631_s25  ;;  %262 = vrot.lane.b32.xlu1 %v774_v4, %s631_s25  ;;  %v235_v25 = vadd.f32 %v234_v21, %v233_v19  ;;  %v225_v38 = vsub.f32 %v774_v4, %v213_v30  ;;  %v180_v39 = vadd.f32 %v179_v31, %v178_v35  ;;  %v175_v41 = vand.u32 2147483647, %v170_v34  ;;  %v201_v8 = vld [vmem:[#allocation3 + $0x8] sm:$0x7f]  ;;  %v251_v31 = vld [vmem:[#allocation3 + $0x10] sm:$0xff]  ;;  %s544_s9 = scalar_lea.vmem %s841_s5, 64 }
  0x44   : > { %v181_v42 = vsel %vm156_vm0, %v174_v33, 0.0  ;;  %v240_v43 = vsel %vm232_vm1, %v230_v37, 0.0  ;;  %v171_v44 = vsub.f32 %v774_v4, %v778_v5  ;;  %vm248_vm2 = vcmask 129024   ;;  %p545_p8 = scmp.ne.s32.totalorder %s841_s5, %s544_s9  ;;  %p896_p9 = scmp.ne.s32.totalorder %s892_s19, 0 }
  0x45   : > { %v237_v32 = vadd.f32 %v236_v27, %v235_v25  ;;  %v231_v45 = vand.u32 2147483647, %v225_v38  ;;  %v182_v46 = vadd.f32 %v181_v42, %v180_v39  ;;  %v183_v48 = vsel %vm156_vm0, %v175_v41, 0.0  ;;  %s634_s17 = smov [#allocation7]  }
  0x46   : > { %v176_v49 = vand.u32 2147483647, %v171_v44  ;;  %vm282_vm3 = vcmask 130056   ;;  %vm299_vm4 = vcmask 121856   ;;  %vm331_vm5 = vcmask 1041409   ;;  %p546_p11 = pnand %p545_p8, %p896_p9  ;;  %s548_s22 = sshll.u32 %s634_s17, 4  ;;  %s549_s22 = int_to_ptr.vmem [resolvable:$false] %s548_s22 }
  0x47   : > { %v239_v40 = vadd.f32 %v238_v36, %v237_v32  ;;  %v242_v50 = vsel %vm232_vm1, %v231_v45, 0.0  ;;  %v184_v51 = vadd.f32 %v183_v48, %v182_v46  ;;  %vm333_vm6 = vcmask 1042434   ;;  %s550_s23 = scalar_lea.vmem %s549_s22, 128  ;;  %p551_p10 = scmp.lt.s32.totalorder %s841_s5, %s549_s22 }
  0x48   : > { %v185_v53 = vsel %vm156_vm0, %v176_v49, 0.0  ;;  %vm336_vm7 = vcmask 124928   ;;  %p547_p13 = pneg %p546_p11  ;;  %p552_p12 = scmp.lt.s32.totalorder %s550_s23, %s544_s9 }
  0x49   : > { %v241_v47 = vadd.f32 %v240_v43, %v239_v40  ;;  %v186_v57 = vadd.f32 %v185_v53, %v184_v51 }
  0x4a   : > { %p553_p1 = por %p552_p12, %p551_p10 }
  0x4b   : > { %v243_v52 = vadd.f32 %v242_v50, %v241_v47  ;;  %v187_v9 = vadd.f32 %v186_v57, %v166_v7 }
  0x4c   : > { %p554_p3 = pnand %p553_p1, %p547_p13 }
  0x4d   : > { %v245_v58 = vrot.slane %v243_v52, 1  ;;  %188 = vst.msk [vmem:[#allocation3] sm:$0xff] %vm156_vm0, %v187_v9 }
  0x4f   : > { %v247_v10 = vadd.f32 %v245_v58, %v201_v8 }
  0x51   : > { %249 = vst.msk [vmem:[#allocation3 + $0x8] sm:$0x7f] %vm248_vm2, %v247_v10 }
  0x58   : > { %v305_v27 = vld [vmem:[#allocation3 + $0x8] sm:$0xff] }
  0x59   : > { %v314_v28 = vsel %vm156_vm0, %v305_v27, 0.0 }
  0x5a   : > { %v315_v30 = vrot.slane %v314_v28, 4 }
  0x5c   : > { %v316_v35 = vadd.f32 %v315_v30, %v314_v28 }
  0x5e   : > { %v317_v37 = vrot.slane %v316_v35, 2 }
  0x60   : > { %v318_v39 = vadd.f32 %v317_v37, %v316_v35 }
  0x62   : > { %v319_v44 = vrot.slane %v318_v39, 1 }
  0x64   : > { %v320_v48 = vadd.f32 %v319_v44, %v318_v39 }
  0xad   : > { %v253_v54 = vpop.permute.xlu0 %252  ;;  %v257_v55 = vpop.permute.xlu1 %256 }
  0xae   : > { %v270_v56 = vsub.f32 %v764_v0, %v253_v54  ;;  %v272_v59 = vsub.f32 %v766_v1, %v257_v55 }
  0xb0   : > { %v276_v62 = vand.u32 2147483647, %v270_v56  ;;  %v278_v11 = vand.u32 2147483647, %v272_v59 }
  0xb1   : > { %v255_v60 = vpop.permute.xlu0 %254  ;;  %v259_v61 = vpop.permute.xlu1 %258 }
  0xb2   : > { %v271_v63 = vsub.f32 %v770_v2, %v255_v60  ;;  %v273_v6 = vsub.f32 %v772_v3, %v259_v61  ;;  %v283_v1 = vsel %vm282_vm3, %v276_v62, 0.0  ;;  %v286_v17 = vsel %vm282_vm3, %v278_v11, 0.0 }
  0xb4   : > { %v277_v12 = vand.u32 2147483647, %v271_v63  ;;  %v279_v0 = vand.u32 2147483647, %v273_v6 }
  0xb5   : > { %v261_v13 = vpop.permute.xlu0 %260  ;;  %v263_v14 = vpop.permute.xlu1 %262 }
  0xb6   : > { %v284_v2 = vsel %vm282_vm3, %v277_v12, 0.0  ;;  %v274_v3 = vsub.f32 %v778_v5, %v261_v13  ;;  %v275_v15 = vsub.f32 %v774_v4, %v263_v14  ;;  %v288_v18 = vsel %vm282_vm3, %v279_v0, 0.0  ;;  %v304_v5 = vld [vmem:[#allocation3] sm:$0xff] }
  0xb7   : > { %v285_v16 = vadd.f32 %v284_v2, %v283_v1  ;;  %v307_v4 = vsel %vm156_vm0, %v304_v5, 0.0 }
  0xb8   : > { %v280_v19 = vand.u32 2147483647, %v274_v3  ;;  %v281_v20 = vand.u32 2147483647, %v275_v15  ;;  %v308_v29 = vrot.slane %v307_v4, 4 }
  0xb9   : > { %v287_v21 = vadd.f32 %v286_v17, %v285_v16 }
  0xba   : > { %v290_v22 = vsel %vm282_vm3, %v280_v19, 0.0  ;;  %v292_v24 = vsel %vm282_vm3, %v281_v20, 0.0  ;;  %v309_v34 = vadd.f32 %v308_v29, %v307_v4 }
  0xbb   : > { %v289_v23 = vadd.f32 %v288_v18, %v287_v21 }
  0xbc   : > { %v310_v36 = vrot.slane %v309_v34, 2 }
  0xbd   : > { %v291_v25 = vadd.f32 %v290_v22, %v289_v23 }
  0xbe   : > { %v311_v38 = vadd.f32 %v310_v36, %v309_v34 }
  0xbf   : > { %v293_v26 = vadd.f32 %v292_v24, %v291_v25 }
  0xc0   : > { %v312_v43 = vrot.slane %v311_v38, 1 }
  0xc1   : > { %295 = vrot.lane.b32.xlu0 %v293_v26, %s633_s18 }
  0xc2   : > { %v313_v47 = vadd.f32 %v312_v43, %v311_v38 }
  0xc4   : > { %v332_v51 = vsel %vm331_vm5, %v320_v48, %v313_v47 }
 0x133   : > { %v296_v32 = vpop.permute.xlu0 %295 }
 0x134   : > { %v298_v33 = vadd.f32 %v296_v32, %v251_v31 }
 0x136   : > { %300 = vst.msk [vmem:[#allocation3 + $0x10] sm:$0xff] %vm299_vm4, %v298_v33 }
 0x13d   : > { %v306_v40 = vld [vmem:[#allocation3 + $0x10] sm:$0xff] }
 0x13e   : > { %v321_v41 = vsel %vm156_vm0, %v306_v40, 0.0 }
 0x13f   : > { %v322_v42 = vrot.slane %v321_v41, 4 }
 0x141   : > { %v323_v45 = vadd.f32 %v322_v42, %v321_v41 }
 0x143   : > { %v324_v46 = vrot.slane %v323_v45, 2 }
 0x145   : > { %v325_v49 = vadd.f32 %v324_v46, %v323_v45 }
 0x147   : > { %v326_v50 = vrot.slane %v325_v49, 1 }
 0x149   : > { %v327_v52 = vadd.f32 %v326_v50, %v325_v49 }
 0x14b   : > { %v334_v53 = vsel %vm333_vm6, %v327_v52, %v332_v51 }
 0x14c   : > { %337 = vst.msk [vmem:[%s150_s2] sm:$0x7] %vm336_vm7, %v334_v53 }
 0x14d   : > { %557 = shalt.err (!%p554_p3)
}
 0x14e   : > { %s558_s24 = scalar_lea.hbm %s839_s15, 64  ;;  %s562_s29 = scalar_lea.hbm %s888_s1, 384 }
 0x14f   : > { %p559_p5 = scmp.ne.s32.totalorder %s839_s15, %s558_s24  ;;  %p563_p0 = scmp.lt.u32.totalorder %s839_s15, %s888_s1 }
 0x150   : > { %p564_p2 = scmp.lt.u32.totalorder %s562_s29, %s558_s24  ;;  %p566_p8 = scmp.lt.u32.totalorder %s558_s24, %s839_s15 }
 0x151   : > { %p560_p6 = pnand %p559_p5, %p896_p9 }
 0x152   : > { %p565_p4 = por %p564_p2, %p563_p0 }
 0x153   : > { %p561_p7 = pneg %p560_p6 }
 0x154   : > { %p567_p11 = por %p566_p8, %p565_p4 }
 0x156   : > { %p568_p13 = pnand %p567_p11, %p561_p7 }
 0x158   : > { %571 = shalt.err (!%p568_p13)
}
 0x159   : > { %449 = dma.vmem_to_hbm [thread:$0]  (%p896_p9), %s841_s5, 64, %s839_s15, %s339_s16  }
 0x15a PF: > { %p460_p10 = scmp.ge.s32.totalorder %s626_s11, 2  ;;  %s364_s25 = sand.u32 1, %s606_s6  }
 0x15b   : > { %p897_p12 = scmp.ne.s32.totalorder %s893_s21, 0  ;;  %s365_s18 = scalar_lea.sflag [#allocation6], %s364_s25 }
 0x15d   : > { %p456_p1 = pnand %p460_p10, %p897_p12 }
 0x15f   : > { %601 = dma.done.wait (!%p456_p1), %s365_s18, 64  }
 0x160   : > { %603 = vsyncadd (!%p456_p1), %s365_s18, 4294967232  ;;  %s17_s11 = sadd.s32 1, %s626_s11   ;;  %s898_s6 = smov %s610_s7 }
 0x161   : > { %p14_p3 = scmp.ge.s32.totalorder %s17_s11, 8   ;;  %s899_s7 = smov %s614_s8 }
 0x162   : > { %s900_s8 = smov %s701_s20  ;;  %s901_s9 = smov %s622_s10 }
 0x163   : > { %s902_s10 = smov %s904_s14  ;;  %16 = sbr.rel (!%p14_p3) target bundleno = 6 (0x6), region = 83 }
 0x16a   :  { %370 = vsyncpa [#allocation5], 1 }
 0x16b   :  { %372 = vsyncpa [#allocation5 + $0x1], 1 }
 0x16c   :  { %373 = vsyncpa [#allocation6], 1 }
 0x16d   :  { %375 = vsyncpa [#allocation6 + $0x1], 1 }

</bundles_post_ra>
